<compile_context>
chip_gen: v7x
topology: tpu7x:2x2x1
jax: 0.10.0
libtpu: 0.0.40
codegen_flags: <defaults>
</compile_context>

<pallas_src>
import functools
import math

import jax
import jax.numpy as jnp
from jax.experimental import pallas as pl
from jax.experimental.pallas import tpu as pltpu


def _round_up(v: int, m: int) -> int:
    return (v + m - 1) // m * m


def _pool_proj_kernel(x_ref, w_ref, b_ref, o_ref, *, kernel_size, stride, t_out_pad):
    """Fused AvgPool1d(time) + Linear(hidden) for one (batch, D-tile) grid step.

    x_ref : (T_pad, H_pad)        encoder last_hidden_state (batch dim squeezed)
    w_ref : (H_pad, TILE_D)       projection weight slice (W.T), native compute dtype
    b_ref : (1, TILE_D)           projection bias slice, float32
    o_ref : (t_out_pad, TILE_D)   output tile (batch dim squeezed)
    """
    # --- AvgPool1d as kernel_size strided slice-adds on the VPU (f32 accumulation). ---
    acc = x_ref[pl.ds(0, t_out_pad, stride=stride), :].astype(jnp.float32)
    for j in range(1, kernel_size):
        acc = acc + x_ref[pl.ds(j, t_out_pad, stride=stride), :].astype(jnp.float32)
    pooled = acc * jnp.float32(1.0 / kernel_size)                      # (t_out_pad, H_pad) f32

    # --- Linear projection on the MXU: native-dtype operands, f32 accumulator. ---
    proj = jnp.dot(pooled.astype(w_ref.dtype), w_ref[...],
                   preferred_element_type=jnp.float32)                 # (t_out_pad, TILE_D) f32
    o_ref[...] = (proj + b_ref[...]).astype(o_ref.dtype)


def audio_encoder_forward(encoder_hidden, proj_weight, proj_bias, *, kernel_size, stride):
    """encoder_hidden: (B, T, H) last_hidden_state of the audio encoder.

    proj_weight: (D, H)  (nn.Linear convention)
    proj_bias:   (D,)
    Returns (B, T_out, D), T_out = floor((T - k) / s) + 1  (AvgPool1d, no padding).
    """
    B, T, H = encoder_hidden.shape
    D = proj_weight.shape[0]
    t_out = (T - kernel_size) // stride + 1
    compute_dtype = encoder_hidden.dtype

    # ---- alignment padding (sliced off again at the end) ----
    t_out_pad = _round_up(t_out, 8)                       # sublane-aligned output rows
    d_pad = _round_up(D, 128)                             # lane-dense output columns
    h_pad = _round_up(H, 128)                             # lane-dense x / aligned matmul K
    t_needed = (t_out_pad - 1) * stride + kernel_size     # cover strided reads of padded rows
    t_pad = _round_up(max(T, t_needed), 8)

    x = encoder_hidden
    if t_pad != T or h_pad != H:
        x = jnp.pad(x, ((0, 0), (0, t_pad - T), (0, h_pad - H)))

    w_t = proj_weight.T.astype(compute_dtype)             # (H, D) matmul-friendly layout
    b = proj_bias.astype(jnp.float32)
    if h_pad != H or d_pad != D:
        w_t = jnp.pad(w_t, ((0, h_pad - H), (0, d_pad - D)))
    if d_pad != D:
        b = jnp.pad(b, ((0, d_pad - D),))
    b2d = b.reshape(1, d_pad)

    # D tiling: multiple of 128, <= 512, divides d_pad (keeps v7x 64 MiB VMEM comfortable and
    # gives the megacore scheduler a second parallel axis).
    tile_d = math.gcd(d_pad, 512)
    n_d = d_pad // tile_d

    itemsize = jnp.dtype(compute_dtype).itemsize
    est = 2 * (t_pad * h_pad * itemsize          # x block (double-buffered)
               + h_pad * tile_d * itemsize       # weight tile
               + tile_d * 4                      # bias tile
               + t_out_pad * tile_d * itemsize)  # output tile
    vmem_limit = int(min(max(est + (2 << 20), 8 << 20), 64 << 20))

    kernel = functools.partial(
        _pool_proj_kernel, kernel_size=kernel_size, stride=stride, t_out_pad=t_out_pad
    )

    out = pl.pallas_call(
        kernel,
        out_shape=jax.ShapeDtypeStruct((B, t_out_pad, d_pad), compute_dtype),
        grid_spec=pltpu.PrefetchScalarGridSpec(
            num_scalar_prefetch=0,
            grid=(B, n_d),
            in_specs=[
                pl.BlockSpec((None, t_pad, h_pad), lambda b, d: (b, 0, 0)),   # x, per batch
                pl.BlockSpec((h_pad, tile_d), lambda b, d: (0, d)),           # W.T D-tile
                pl.BlockSpec((1, tile_d), lambda b, d: (0, d)),               # bias D-tile
            ],
            out_specs=pl.BlockSpec((None, t_out_pad, tile_d), lambda b, d: (b, 0, d)),
        ),
        compiler_params=pltpu.CompilerParams(
            dimension_semantics=("parallel", "parallel"),
            vmem_limit_bytes=vmem_limit,
        ),
    )(x, w_t, b2d)

    return out[:, :t_out, :D]


if __name__ == "__main__":
    # Small, deterministic synthetic config
    B, T, H = 2, 16, 64          # batch, encoder seq len, encoder hidden size
    D = 32                        # llm_embedding_channels
    kernel_size, stride = 4, 2    # AvgPool1d config
    random_range = 0.5

    key = jax.random.PRNGKey(0)
    k_x, k_w, k_b, k_eos = jax.random.split(key, 4)

    # "encoder last_hidden_state" stand-in (the pretrained encoder itself is not translated).
    encoder_hidden = jax.random.normal(k_x, (B, T, H), dtype=jnp.float32)

    # embed_projection = nn.Linear(H, D): weight (D, H), bias (D,)
    proj_weight = jax.random.normal(k_w, (D, H), dtype=jnp.float32) * 0.02
    proj_bias = jax.random.normal(k_b, (D,), dtype=jnp.float32) * 0.02

    # eos_embedding parameter (declared in __init__ but unused in forward) — mirrored for parity.
    eos_embedding = jax.random.uniform(
        k_eos, (1, D), minval=-random_range, maxval=random_range, dtype=jnp.float32
    )
    del eos_embedding  # not used by forward()

    out = audio_encoder_forward(
        encoder_hidden, proj_weight, proj_bias, kernel_size=kernel_size, stride=stride
    )
    out = jax.block_until_ready(out)

    # Pure-JAX reference for the pooling + projection path.
    t_out = (T - kernel_size) // stride + 1
    windows = jnp.stack(
        [encoder_hidden[:, t * stride: t * stride + kernel_size, :].mean(axis=1)
         for t in range(t_out)],
        axis=1,
    )                                                       # (B, t_out, H)
    ref = windows @ proj_weight.T + proj_bias               # (B, t_out, D)

    assert out.shape == (B, t_out, D), out.shape
    assert jnp.allclose(out, ref, atol=1e-4, rtol=1e-4), float(jnp.max(jnp.abs(out - ref)))

    print("KERNEL_OK")
</pallas_src>

<mosaic_0001>
module attributes {stable_mosaic.version = 11 : i64} {
  func.func @_pool_proj_kernel(%arg0: i32, %arg1: i32, %arg2: memref<1x24x128xf32, #tpu.memory_space<vmem>>, %arg3: memref<128x128xf32, #tpu.memory_space<vmem>>, %arg4: memref<1x128xf32, #tpu.memory_space<vmem>>, %arg5: memref<1x8x128xf32, #tpu.memory_space<vmem>>) attributes {dimension_semantics = [#tpu.dimension_semantics<parallel>, #tpu.dimension_semantics<parallel>], iteration_bounds = array<i64: 2, 1>, scalar_prefetch = 0 : i64, scratch_operands = 0 : i64, tpu.core_type = #tpu.core_type<tc>, window_params = [{transform_indices = @transform_0, window_bounds = array<i64: 1, 24, 128>}, {transform_indices = @transform_1, window_bounds = array<i64: 128, 128>}, {transform_indices = @transform_2, window_bounds = array<i64: 1, 128>}, {transform_indices = @transform_3, window_bounds = array<i64: 1, 8, 128>}]} {
    %c0 = arith.constant 0 : index
    %c0_0 = arith.constant 0 : index
    %c0_1 = arith.constant 0 : index
    %0 = tpu.strided_load %arg2[%c0, %c0_0, %c0_1] {strides = array<i32: 1, 2, 1>} : memref<1x24x128xf32, #tpu.memory_space<vmem>>, vector<1x8x128xf32>
    %1 = vector.shape_cast %0 : vector<1x8x128xf32> to vector<8x128xf32>
    %c0_2 = arith.constant 0 : index
    %c1 = arith.constant 1 : index
    %c0_3 = arith.constant 0 : index
    %2 = tpu.strided_load %arg2[%c0_2, %c1, %c0_3] {strides = array<i32: 1, 2, 1>} : memref<1x24x128xf32, #tpu.memory_space<vmem>>, vector<1x8x128xf32>
    %3 = vector.shape_cast %2 : vector<1x8x128xf32> to vector<8x128xf32>
    %4 = arith.addf %1, %3 : vector<8x128xf32>
    %c0_4 = arith.constant 0 : index
    %c2 = arith.constant 2 : index
    %c0_5 = arith.constant 0 : index
    %5 = tpu.strided_load %arg2[%c0_4, %c2, %c0_5] {strides = array<i32: 1, 2, 1>} : memref<1x24x128xf32, #tpu.memory_space<vmem>>, vector<1x8x128xf32>
    %6 = vector.shape_cast %5 : vector<1x8x128xf32> to vector<8x128xf32>
    %7 = arith.addf %4, %6 : vector<8x128xf32>
    %c0_6 = arith.constant 0 : index
    %c3 = arith.constant 3 : index
    %c0_7 = arith.constant 0 : index
    %8 = tpu.strided_load %arg2[%c0_6, %c3, %c0_7] {strides = array<i32: 1, 2, 1>} : memref<1x24x128xf32, #tpu.memory_space<vmem>>, vector<1x8x128xf32>
    %9 = vector.shape_cast %8 : vector<1x8x128xf32> to vector<8x128xf32>
    %10 = arith.addf %7, %9 : vector<8x128xf32>
    %cst = arith.constant 2.500000e-01 : f32
    %11 = vector.broadcast %cst : f32 to vector<8x128xf32>
    %12 = arith.mulf %10, %11 : vector<8x128xf32>
    %c0_8 = arith.constant 0 : index
    %c0_9 = arith.constant 0 : index
    %13 = vector.load %arg3[%c0_8, %c0_9] : memref<128x128xf32, #tpu.memory_space<vmem>>, vector<128x128xf32>
    %cst_10 = arith.constant dense<0.000000e+00> : vector<8x128xf32>
    %14 = tpu.matmul %12, %13, %cst_10 {dimension_numbers = #tpu.dot_dimension_numbers<[1], [0], [0], [1], [0, 0, 1, 1], [], []>} : vector<8x128xf32>, vector<128x128xf32>, vector<8x128xf32> -> vector<8x128xf32>
    %c0_11 = arith.constant 0 : index
    %c0_12 = arith.constant 0 : index
    %15 = vector.load %arg4[%c0_11, %c0_12] : memref<1x128xf32, #tpu.memory_space<vmem>>, vector<1x128xf32>
    %16 = vector.broadcast %15 : vector<1x128xf32> to vector<8x128xf32>
    %17 = arith.addf %14, %16 : vector<8x128xf32>
    %c0_13 = arith.constant 0 : index
    %c0_14 = arith.constant 0 : index
    %c0_15 = arith.constant 0 : index
    %18 = vector.load %arg5[%c0_13, %c0_14, %c0_15] : memref<1x8x128xf32, #tpu.memory_space<vmem>>, vector<1x8x128xf32>
    %19 = vector.shape_cast %18 : vector<1x8x128xf32> to vector<8x128xf32>
    %20 = vector.shape_cast %17 : vector<8x128xf32> to vector<1x8x128xf32>
    tpu.vector_store %arg5[%c0_13, %c0_14, %c0_15], %20 {strides = array<i32>} : memref<1x8x128xf32, #tpu.memory_space<vmem>>, vector<1x8x128xf32>,
    return
  }
  func.func @transform_0(%arg0: i32, %arg1: i32) -> (i32, i32, i32) {
    %c0_i32 = arith.constant 0 : i32
    %c0_i32_0 = arith.constant 0 : i32
    %c0_i32_1 = arith.constant 0 : i32
    return %arg0, %c0_i32, %c0_i32_0 : i32, i32, i32
  }
  func.func @transform_1(%arg0: i32, %arg1: i32) -> (i32, i32) {
    %c0_i32 = arith.constant 0 : i32
    %c0_i32_0 = arith.constant 0 : i32
    return %c0_i32, %arg1 : i32, i32
  }
  func.func @transform_2(%arg0: i32, %arg1: i32) -> (i32, i32) {
    %c0_i32 = arith.constant 0 : i32
    %c0_i32_0 = arith.constant 0 : i32
    return %c0_i32, %arg1 : i32, i32
  }
  func.func @transform_3(%arg0: i32, %arg1: i32) -> (i32, i32, i32) {
    %c0_i32 = arith.constant 0 : i32
    %c0_i32_0 = arith.constant 0 : i32
    return %arg0, %c0_i32, %arg1 : i32, i32, i32
  }
}

</mosaic_0001>

<bundles_post_ra>
// kernel: tpu_custom_call.1
= control target key start
LH: loop header
LB: loop body
LE: loop exit
PB: predicated region body
PF: predicated region fallthrough
CT: control target
= control target key end

     0   :  { %8 = vsyncpa [#allocation3], 0  ;;  %s1038_s0 = inlined_call_operand.hbm [shape: f32[2,24,128], index: 0, kind: input, shape index: {}]   ;;  %s1039_s1 = inlined_call_operand.hbm [shape: f32[128,128], index: 1, kind: input, shape index: {}]   ;;  %s1040_s2 = inlined_call_operand.vmem [shape: f32[1,128], index: 2, kind: input, shape index: {}]   ;;  %s1041_s3 = inlined_call_operand.hbm [shape: f32[2,8,128], index: 3, kind: output, shape index: {}]  }
   0x1   :  { %10 = vsyncpa [#allocation3 + $0x1], 0 }
   0x2   :  { %11 = vsyncpa [#allocation6], 0 }
   0x3   :  { %12 = vsyncpa [#allocation4], 0 }
   0x4   :  { %14 = vsyncpa [#allocation4 + $0x1], 0  ;;  %s811_s12 = smov 0   ;;  %s813_s13 = smov 0  }
   0x5   :  { %s815_s14 = smov 0   ;;  %s817_s15 = smov 0  }
   0x6   :  { %s819_s16 = smov 0   ;;  %s821_s17 = smov 0  }
   0x7 LB: > { %s462_s18 = sadd.s32 4294967295, %s781_s17   ;;  %s463_s19 = sadd.s32 4294967294, %s781_s17   ;;  %s781_s17 = sphi %s821_s17, %s20_s17   ;;  %s777_s16 = sphi %s819_s16, %s1064_s16   ;;  %s773_s15 = sphi %s817_s15, %s1063_s15   ;;  %s769_s14 = sphi %s815_s14, %s1062_s14   ;;  %s765_s13 = sphi %s813_s13, %s1061_s13   ;;  %s761_s12 = sphi %s811_s12, %s1060_s12  }
   0x8   : > { %p52_p0 = scmp.ne.s32.totalorder %s765_s13, %s761_s12  ;;  %p845_p1 = scmp.eq.s32.totalorder %s462_s18, 0 }
   0x9   : > { %p849_p2 = scmp.eq.s32.totalorder %s462_s18, 1  ;;  %p136_p3 = scmp.eq.s32.totalorder %s463_s19, 1 }
   0xa   : > { %s1046_s20 = scalar_select %p845_p1, 1, 0 }
   0xb   : > { %s1047_s21 = scalar_select %p849_p2, 1, 0 }
   0xc   : > { %p855_p4 = por %p845_p1, %p52_p0  ;;  %p464_p5 = scmp.ge.s32.totalorder %s781_s17, 1 }
   0xd   : > { %p860_p6 = por %p136_p3, %p52_p0  ;;  %p143_p7 = scmp.lt.s32.totalorder %s781_s17, 3 }
   0xe   : > { %s1048_s22 = scalar_select %p855_p4, 1, 0 }
   0xf   : > { %s1049_s23 = scalar_select %p860_p6, 1, 0 }
  0x10   : > { %p865_p8 = pnand %p464_p5, %p143_p7  ;;  %s783_s25 = smov [#allocation5]  }
  0x11   : > { %s157_s26 = sshll.u32 %s783_s25, 4  ;;  %s32_s28 = sadd.s32 1, %s777_s16  ;;  %s158_s26 = int_to_ptr.vmem [resolvable:$true] %s157_s26 }
  0x12   : > { %s1050_s24 = scalar_select %p865_p8, 1, 0 }
  0x13   : > { %p567_p9 = pneg %p865_p8  ;;  %s637_s4 = scalar_lea.hbm %s1039_s1, 2048 }
  0x14   : > { %p638_p12 = scmp.ne.s32.totalorder %s1039_s1, %s637_s4  ;;  %p644_p5 = scmp.lt.u32.totalorder %s637_s4, %s1039_s1 }
  0x15   : > { %p874_p11 = pnand %p567_p9, %p845_p1 }
  0x17   : > { %p639_p13 = pneg %p874_p11 }
  0x19   : > { %p640_p0 = pnand %p639_p13, %p638_p12 }
  0x1b   : > { %p641_p3 = pneg %p640_p0 }
  0x1d   : > { %p646_p7 = pnand %p644_p5, %p641_p3 }
  0x1f   : > { %649 = shalt.err (!%p646_p7)
}
  0x20   : > { %s650_s9 = scalar_lea.vmem %s158_s26, 2048  ;;  %p658_p1 = scmp.lt.s32.totalorder %s158_s26, %s158_s26 }
  0x21   : > { %p651_p9 = scmp.ne.s32.totalorder %s158_s26, %s650_s9  ;;  %p659_p4 = scmp.lt.s32.totalorder %s650_s9, %s650_s9 }
  0x23   : > { %p653_p10 = pnand %p651_p9, %p639_p13  ;;  %p660_p8 = por %p659_p4, %p658_p1 }
  0x25   : > { %p654_p6 = pneg %p653_p10 }
  0x27   : > { %p661_p2 = pnand %p660_p8, %p654_p6 }
  0x29   : > { %664 = shalt.err (!%p661_p2)
}
  0x2a   : > { %s784_s10 = smov 128   ;;  %s785_s11 = smov 8  }
  0x2b   : > { %570 = dma.hbm_to_vmem [thread:$0]  (!%p874_p11), %s1039_s1, 2048, %s158_s26, [#allocation6], %s784_s10, %s784_s10, %s785_s11  }
  0x2c   : > { %p34_p1 = scmp.ge.s32.totalorder %s32_s28, 2  ;;  %s39_s25 = sadd.s32 1, %s769_s14 }
  0x2d   : > { %p46_p2 = scmp.ne.s32.totalorder %s769_s14, %s765_s13  ;;  %p47_p4 = scmp.eq.s32.totalorder %s781_s17, 0 }
  0x2e   : > { %s1066_s28 = smov (%p34_p1, %s32_s28), 0  ;;  %p1052_p8 = scmp.ne.s32.totalorder %s1047_s21, 0 }
  0x2f   : > { %p48_p6 = por %p47_p4, %p46_p2  ;;  %s36_s27 = ssub.s32 %s777_s16, %s1066_s28 }
  0x30   : > { %p906_p10 = por %p1052_p8, %p46_p2  ;;  %p580_p12 = scmp.lt.s32.totalorder %s781_s17, 2 }
  0x31   : > { %p37_p13 = scmp.eq.s32.totalorder %s36_s27, 0  ;;  %s177_s30 = sand.u32 1, %s769_s14  }
  0x32   : > { %s556_s4 = smul.u32 24, %s177_s30  ;;  %p918_p11 = pnand %p580_p12, %p48_p6 }
  0x33   : > { %s915_s5 = scalar_select %p37_p13, %s769_s14, %s39_s25  }
  0x34   : > { %s557_s26 = smul.u32 384, %s777_s16  ;;  %s181_s6 = scalar_lea.vmem [#allocation2], %s556_s4 }
  0x35   : > { %s188_s7 = sshll.u32 %s181_s6, 4  ;;  %s929_s19 = scalar_lea.sflag [#allocation3], %s177_s30  ;;  %s927_s7 = int_to_ptr.vmem [resolvable:$true] %s188_s7 }
  0x36   : > { %s925_s18 = scalar_lea.hbm %s1038_s0, %s557_s26  ;;  %p667_p3 = pneg %p918_p11 }
  0x37   : > { %s665_s25 = scalar_lea.hbm %s925_s18, 384  ;;  %s670_s26 = scalar_lea.hbm %s1038_s0, 768 }
  0x38   : > { %p666_p0 = scmp.ne.s32.totalorder %s925_s18, %s665_s25  ;;  %p671_p9 = scmp.lt.u32.totalorder %s925_s18, %s1038_s0 }
  0x39   : > { %p672_p1 = scmp.lt.u32.totalorder %s670_s26, %s665_s25  ;;  %p674_p4 = scmp.lt.u32.totalorder %s665_s25, %s925_s18 }
  0x3a   : > { %p668_p5 = pnand %p667_p3, %p666_p0 }
  0x3b   : > { %p673_p2 = por %p672_p1, %p671_p9 }
  0x3c   : > { %p669_p7 = pneg %p668_p5 }
  0x3d   : > { %p675_p6 = por %p674_p4, %p673_p2 }
  0x3f   : > { %p676_p8 = pnand %p675_p6, %p669_p7 }
  0x41   : > { %679 = shalt.err (!%p676_p8)
}
  0x42   : > { %s680_s30 = scalar_lea.vmem %s927_s7, 384  ;;  %s786_s21 = smov [#allocation2]  }
  0x43   : > { %p681_p12 = scmp.ne.s32.totalorder %s927_s7, %s680_s30  ;;  %s685_s27 = sshll.u32 %s786_s21, 4  ;;  %s686_s27 = int_to_ptr.vmem [resolvable:$false] %s685_s27 }
  0x44   : > { %s687_s4 = scalar_lea.vmem %s686_s27, 768  ;;  %p688_p5 = scmp.lt.s32.totalorder %s927_s7, %s686_s27 }
  0x45   : > { %p683_p13 = pnand %p681_p12, %p667_p3  ;;  %p689_p9 = scmp.lt.s32.totalorder %s687_s4, %s680_s30 }
  0x47   : > { %p684_p0 = pneg %p683_p13  ;;  %p690_p1 = por %p689_p9, %p688_p5 }
  0x49   : > { %p691_p2 = pnand %p690_p1, %p684_p0 }
  0x4b   : > { %694 = shalt.err (!%p691_p2)
}
  0x4c   : > { %574 = dma.hbm_to_vmem [thread:$0]  (!%p918_p11), %s925_s18, 384, %s927_s7, %s929_s19, %s784_s10, %s784_s10, %s785_s11  }
  0x4d   : > { %p1055_p3 = scmp.ne.s32.totalorder %s1050_s24, 0 }
  0x4e   : > { %s963_s25 = sand.u32 (!%p1055_p3), 1, %s765_s13   ;;  %p1056_p7 = scmp.ne.s32.totalorder (!%p1055_p3), %s1048_s22, 0 }
  0x4f   : > { %200 = sbr.rel (%p1055_p3) target bundleno = 353 (0x161), region = 32  ;;  %s203_s6 = scalar_lea.sflag (!%p1055_p3), [#allocation3], %s963_s25 }
  0x50   : > { %s558_s26 = smul.u32 (!%p1055_p3), 24, %s963_s25 }
  0x52   : > { %s967_s9 = scalar_lea.vmem (!%p1055_p3), [#allocation2], %s558_s26 }
  0x56   : > { %748 = dma.done.wait (%p1056_p7), %s203_s6, 384  }
  0x57   : > { %750 = vsyncadd (%p1056_p7), %s203_s6, 4294966912  ;;  %p1057_p11 = scmp.ne.s32.totalorder %s1046_s20, 0 }
  0x59   : > { %752 = dma.done.wait (%p1057_p11), [#allocation6], 2048  }
  0x5a   : > { %754 = vsyncadd (%p1057_p11), [#allocation6], 4294965248  ;;  %v787_v0 = vmov 0.0|0.0   ;;  %vm788_vm0 = vmmov 0   ;;  %v789_v1 = vmov 0.0   ;;  %v250_v2 = vld [vmem:[#allocation5] sm:$0xff] }
  0x5b   : > { %532 = vmatprep.subr.bf16.mxu0 %v787_v0  ;;  %529 = vmatprep.mubr.msk.f32.mxu0 %vm788_vm0, %v789_v1  ;;  %v251_v3 = vld [vmem:[#allocation5 + $0x8] sm:$0xff]  ;;  %v252_v4 = vld [vmem:[#allocation5 + $0x10] sm:$0xff]  ;;  %v253_v6 = vld [vmem:[#allocation5 + $0x18] sm:$0xff]  ;;  %s471_s20 = sshll.u32 %s963_s25, 3  ;;  %s477_s10 = sshll.u32 %s773_s15, 7 }
  0x5c   : > { %v533_v5 = vpack.c.bf16 %v251_v3, %v250_v2  ;;  %v536_v7 = vpack.c.bf16 %v253_v6, %v252_v4  ;;  %v254_v8 = vld [vmem:[#allocation5 + $0x20] sm:$0xff]  ;;  %v255_v9 = vld [vmem:[#allocation5 + $0x28] sm:$0xff]  ;;  %v256_v11 = vld [vmem:[#allocation5 + $0x30] sm:$0xff]  ;;  %s235_s11 = scalar_lea.vmem [#allocation7], %s471_s20  ;;  %s989_s19 = scalar_lea.hbm %s1041_s3, %s477_s10 }
  0x5d   : > { %v539_v10 = vpack.c.bf16 %v255_v9, %v254_v8  ;;  %v257_v12 = vld [vmem:[#allocation5 + $0x38] sm:$0xff]  ;;  %v258_v14 = vld [vmem:[#allocation5 + $0x40] sm:$0xff]  ;;  %v259_v15 = vld [vmem:[#allocation5 + $0x48] sm:$0xff]  ;;  %s359_s7 = sshll.u32 %s235_s11, 4  ;;  %s345_s30 = scalar_lea.sflag [#allocation4], %s963_s25  ;;  %s991_s7 = int_to_ptr.vmem [resolvable:$true] %s359_s7 }
  0x5e   : > { %534 = vmatpush3.bf16.msra.mxu0 %v533_v5  ;;  %v542_v13 = vpack.c.bf16 %v257_v12, %v256_v11  ;;  %v545_v16 = vpack.c.bf16 %v259_v15, %v258_v14  ;;  %v239_v17 = vld [vmem:[%s967_s9] ss:$2 sm:$0xff]  ;;  %v472_v18 = vld [vmem:[%s967_s9 + $0x1] ss:$2 sm:$0xff]  ;;  %v262_v24 = vld [vmem:[#allocation5 + $0x60] sm:$0xff]  ;;  %s695_s21 = scalar_lea.vmem %s991_s7, 128 }
  0x5f   : > { %535 = vmatprep.subr.bf16.mxu0 %v787_v0  ;;  %v260_v19 = vld [vmem:[#allocation5 + $0x50] sm:$0xff]  ;;  %v261_v20 = vld [vmem:[#allocation5 + $0x58] sm:$0xff]  ;;  %v242_v21 = vadd.f32 %v472_v18, %v239_v17  ;;  %v263_v25 = vld [vmem:[#allocation5 + $0x68] sm:$0xff]  ;;  %p696_p4 = scmp.ne.s32.totalorder %s991_s7, %s695_s21  ;;  %s790_s15 = smov [#allocation7]  }
  0x60   : > { %v548_v22 = vpack.c.bf16 %v261_v20, %v260_v19  ;;  %v473_v23 = vld [vmem:[%s967_s9 + $0x2] ss:$2 sm:$0xff]  ;;  %v551_v27 = vpack.c.bf16 %v263_v25, %v262_v24  ;;  %v474_v28 = vld [vmem:[%s967_s9 + $0x3] ss:$2 sm:$0xff]  ;;  %s699_s27 = sshll.u32 %s790_s15, 4  ;;  %s700_s27 = int_to_ptr.vmem [resolvable:$false] %s699_s27 }
  0x61   : > { %v245_v26 = vadd.f32 %v473_v23, %v242_v21  ;;  %v264_v29 = vld [vmem:[#allocation5 + $0x70] sm:$0xff]  ;;  %v265_v30 = vld [vmem:[#allocation5 + $0x78] sm:$0xff]  ;;  %p697_p6 = pnand %p696_p4, %p906_p10  ;;  %s701_s4 = scalar_lea.vmem %s700_s27, 256 }
  0x62   : > { %537 = vmatpush3.bf16.msra.mxu0 %v536_v7  ;;  %v554_v32 = vpack.c.bf16 %v265_v30, %v264_v29  ;;  %v475_v34 = vld [vmem:[%s1040_s2] ss:$0 sm:$0xff]  ;;  %p702_p12 = scmp.lt.s32.totalorder %s991_s7, %s700_s27  ;;  %p703_p13 = scmp.lt.s32.totalorder %s701_s4, %s695_s21 }
  0x63   : > { %538 = vmatprep.subr.bf16.mxu0 %v787_v0  ;;  %v248_v31 = vadd.f32 %v474_v28, %v245_v26  ;;  %p698_p8 = pneg %p697_p6 }
  0x64   : > { %p704_p0 = por %p703_p13, %p702_p12 }
  0x65   : > { %v249_v33 = vmul.f32 0.25, %v248_v31 }
  0x66   : > { %540 = vmatpush3.bf16.msra.mxu0 %v539_v10  ;;  %p705_p5 = pnand %p704_p0, %p698_p8 }
  0x67   : > { %541 = vmatprep.subr.bf16.mxu0 %v787_v0 }
  0x6a   : > { %543 = vmatpush3.bf16.msra.mxu0 %v542_v13 }
  0x6b   : > { %544 = vmatprep.subr.bf16.mxu0 %v787_v0 }
  0x6e   : > { %546 = vmatpush3.bf16.msra.mxu0 %v545_v16 }
  0x6f   : > { %547 = vmatprep.subr.bf16.mxu0 %v787_v0 }
  0x72   : > { %549 = vmatpush3.bf16.msra.mxu0 %v548_v22 }
  0x73   : > { %550 = vmatprep.subr.bf16.mxu0 %v787_v0 }
  0x76   : > { %552 = vmatpush3.bf16.msra.mxu0 %v551_v27 }
  0x77   : > { %553 = vmatprep.subr.bf16.mxu0 %v787_v0 }
  0x7a   : > { %555 = vmatpush3.bf16.msra.mxu0 %v554_v32 }
  0x7d   : > { %530 = vmatmul.mubr.f32.vlgmr.msra.gmra.mrb[0].mxu0 %v249_v33 }
 0x150   : > { %v339_v35 = vpop.f32.mrb[0].mxu0 }
 0x151   : > { %v340_v36 = vadd.f32 %v475_v34, %v339_v35  ;;  %v531_v37 = vpop.f32.mrb[1].mxu0 }
 0x153   : > { %343 = vst [vmem:[%s235_s11] sm:$0xff] %v340_v36 }
 0x154   : > { %708 = shalt.err (!%p705_p5)
}
 0x155   : > { %s709_s25 = scalar_lea.hbm %s989_s19, 128  ;;  %s713_s9 = scalar_lea.hbm %s1041_s3, 256 }
 0x156   : > { %p710_p9 = scmp.ne.s32.totalorder %s989_s19, %s709_s25  ;;  %p714_p3 = scmp.lt.u32.totalorder %s989_s19, %s1041_s3 }
 0x157   : > { %p715_p7 = scmp.lt.u32.totalorder %s713_s9, %s709_s25  ;;  %p717_p4 = scmp.lt.u32.totalorder %s709_s25, %s989_s19 }
 0x158   : > { %p711_p1 = pnand %p710_p9, %p906_p10 }
 0x159   : > { %p716_p11 = por %p715_p7, %p714_p3 }
 0x15a   : > { %p712_p2 = pneg %p711_p1 }
 0x15b   : > { %p718_p6 = por %p717_p4, %p716_p11 }
 0x15d   : > { %p719_p8 = pnand %p718_p6, %p712_p2 }
 0x15f   : > { %722 = shalt.err (!%p719_p8)
}
 0x160   : > { %565 = dma.vmem_to_hbm [thread:$0]  (%p906_p10), %s991_s7, 128, %s989_s19, %s345_s30  }
 0x161 PF: > { %s371_s24 = sand.u32 1, %s761_s12   ;;  %p1058_p12 = scmp.ne.s32.totalorder %s1049_s23, 0 }
 0x162   : > { %p1059_p13 = scmp.ge.s32.totalorder %s781_s17, 2  ;;  %s372_s10 = scalar_lea.sflag [#allocation4], %s371_s24 }
 0x164   : > { %p576_p0 = pnand %p1059_p13, %p1058_p12 }
 0x166   : > { %756 = dma.done.wait (!%p576_p0), %s372_s10, 128  }
 0x167   : > { %758 = vsyncadd (!%p576_p0), %s372_s10, 4294967168  ;;  %s20_s17 = sadd.s32 1, %s781_s17   ;;  %s1060_s12 = smov %s765_s13 }
 0x168   : > { %p17_p5 = scmp.ge.s32.totalorder %s20_s17, 4   ;;  %s1061_s13 = smov %s769_s14 }
 0x169   : > { %s1062_s14 = smov %s915_s5  ;;  %s1063_s15 = smov %s777_s16 }
 0x16a   : > { %s1064_s16 = smov %s1066_s28  ;;  %19 = sbr.rel (!%p17_p5) target bundleno = 7 (0x7), region = 88 }
 0x171   :  { %377 = vsyncpa [#allocation3], 1 }
 0x172   :  { %379 = vsyncpa [#allocation3 + $0x1], 1 }
 0x173   :  { %380 = vsyncpa [#allocation6], 1 }
 0x174   :  { %381 = vsyncpa [#allocation4], 1 }
 0x175   :  { %383 = vsyncpa [#allocation4 + $0x1], 1 }

</bundles_post_ra>
